<compile_context>
chip_gen: v6e
topology: v6e:2x2x1
jax: 0.10.0
libtpu: 0.0.40
codegen_flags: <defaults>
</compile_context>

<pallas_src>
import functools

import jax
import jax.numpy as jnp
from jax import lax
from jax.experimental import pallas as pl
from jax.experimental.pallas import tpu as pltpu

_BP = 8     # batch padded to one sublane tile
_DP = 8     # input features padded to 8 (contraction dim of the projection)
_CP = 128   # class logits padded to lane width


def _lstm_head_kernel(x_ref, w_ih_ref, w_hh_ref, b_ref, w_fc_ref, b_fc_ref,
                      out_ref, *, T, Bp, H):
    """Single-program kernel: full LSTM sequence + fc1 + softmax.

    x_ref   : (T*Bp, Dp)  padded inputs, time-major rows (Bp sublanes / step)
    w_ih_ref: (Dp, 4H)    input->gates weights, gate order [i,f,o,g], f32
    w_hh_ref: (H, 4H)     hidden->gates weights, gate order [i,f,o,g], bf16
    b_ref   : (1, 4H)     b_ih + b_hh, gate order [i,f,o,g]
    w_fc_ref: (H, Cp)     fc1 weights (transposed, zero-padded classes)
    b_fc_ref: (1, Cp)     fc1 bias (-1e30 on padded class columns)
    out_ref : (Bp, Cp)    softmax(fc1(h_T))
    """
    # ---- hoisted input projection: one small MXU tile, bias folded in -----
    xg = (jnp.dot(x_ref[...], w_ih_ref[...],
                  preferred_element_type=jnp.float32)
          + b_ref[...])                                      # (T*Bp, 4H) f32

    w_hh = w_hh_ref[...]                                     # (H, 4H) bf16

    def gate_step(gates, c_prev):
        # Gate order [i, f, o, g]: one sigmoid over a contiguous (Bp, 3H)
        # slice + one tanh over the trailing (Bp, H) slice.  All f32.
        sg = jax.nn.sigmoid(gates[:, :3 * H])
        g_g = jnp.tanh(gates[:, 3 * H:])
        i_g = sg[:, 0:H]
        f_g = sg[:, H:2 * H]
        o_g = sg[:, 2 * H:3 * H]
        c_new = f_g * c_prev + i_g * g_g
        h_new = o_g * jnp.tanh(c_new)
        return h_new, c_new

    # ---- peeled t = 0 (h = c = 0): no h @ w_hh on the serial chain --------
    h, c = gate_step(xg[0:Bp, :], jnp.zeros((Bp, H), jnp.float32))

    # ---- remaining steps, statically unrolled; bf16 MXU operands ----------
    for t in range(1, T):                                    # static unroll
        gates = xg[t * Bp:(t + 1) * Bp, :] + jnp.dot(
            h.astype(jnp.bfloat16), w_hh,
            preferred_element_type=jnp.float32)              # (Bp, 4H) f32
        h, c = gate_step(gates, c)

    # ---- fc1 + softmax(dim=1): exact division (runs once per call) --------
    logits = (jnp.dot(h, w_fc_ref[...], preferred_element_type=jnp.float32)
              + b_fc_ref[...])                               # (Bp, Cp)
    m = jnp.max(logits, axis=-1, keepdims=True)
    e = jnp.exp(logits - m)
    out_ref[...] = e / jnp.sum(e, axis=-1, keepdims=True)


def prepare_params(w_ih, w_hh, b_ih, b_hh, w_fc, b_fc, *, hidden, n_classes):
    """One-time (model-init) weight prep, hoisted OUT of the jitted forward."""
    H = hidden
    # Permute PyTorch gate order [i, f, g, o] -> [i, f, o, g] so the kernel
    # can apply sigmoid to one contiguous 3H slice and tanh to the last H.
    perm = jnp.concatenate([jnp.arange(0, H), jnp.arange(H, 2 * H),
                            jnp.arange(3 * H, 4 * H), jnp.arange(2 * H, 3 * H)])
    w_ih_r = jnp.asarray(w_ih, jnp.float32)[perm]            # (4H, D)
    w_hh_r = jnp.asarray(w_hh, jnp.float32)[perm]            # (4H, H)
    b_r = (jnp.asarray(b_ih, jnp.float32)
           + jnp.asarray(b_hh, jnp.float32))[perm]           # (4H,)

    D = w_ih_r.shape[1]
    w_ih_t = jnp.zeros((_DP, 4 * H), jnp.float32).at[:D, :].set(w_ih_r.T)
    w_hh_t = w_hh_r.T.astype(jnp.bfloat16)                   # MXU operand
    b_gates = b_r.reshape(1, 4 * H)
    w_fc_t = jnp.zeros((H, _CP), jnp.float32).at[:, :n_classes].set(
        jnp.asarray(w_fc, jnp.float32).T)
    b_fc_p = jnp.full((1, _CP), -1e30, jnp.float32).at[0, :n_classes].set(
        jnp.asarray(b_fc, jnp.float32))
    return (w_ih_t, w_hh_t, b_gates, w_fc_t, b_fc_p)


@functools.partial(jax.jit, static_argnames=("hidden", "n_classes"))
def lstm_forward(stock_hist, params, *, hidden, n_classes):
    """stock_hist: (T, B, D) float32.  Returns softmax preds (B, n_classes)."""
    T, B, D = stock_hist.shape
    H = hidden
    w_ih_t, w_hh_t, b_gates, w_fc_t, b_fc_p = params

    # Per-call glue is now input padding only (weights prepped once at init).
    x_p = jnp.zeros((T, _BP, _DP), jnp.float32).at[:, :B, :D].set(stock_hist)
    x_flat = x_p.reshape(T * _BP, _DP)                       # time-major rows

    vmem = pl.BlockSpec(memory_space=pltpu.MemorySpace.VMEM)
    kernel = functools.partial(_lstm_head_kernel, T=T, Bp=_BP, H=H)
    out = pl.pallas_call(
        kernel,
        out_shape=jax.ShapeDtypeStruct((_BP, _CP), jnp.float32),
        in_specs=[vmem] * 6,
        out_specs=vmem,
    )(x_flat, w_ih_t, w_hh_t, b_gates, w_fc_t, b_fc_p)

    return out[:B, :n_classes]


def _reference(stock_hist, w_ih, w_hh, b_ih, b_hh, w_fc, b_fc, hidden):
    """Pure-JAX reference matching torch.nn.LSTM + Linear + Softmax."""
    T, B, D = stock_hist.shape
    H = hidden

    def step(carry, x_t):
        h, c = carry
        gates = x_t @ w_ih.T + b_ih + h @ w_hh.T + b_hh
        i = jax.nn.sigmoid(gates[:, 0 * H:1 * H])
        f = jax.nn.sigmoid(gates[:, 1 * H:2 * H])
        g = jnp.tanh(gates[:, 2 * H:3 * H])
        o = jax.nn.sigmoid(gates[:, 3 * H:4 * H])
        c = f * c + i * g
        h = o * jnp.tanh(c)
        return (h, c), None

    h0 = jnp.zeros((B, H), jnp.float32)
    (h_T, _), _ = lax.scan(step, (h0, h0), stock_hist)
    logits = h_T @ w_fc.T + b_fc
    return jax.nn.softmax(logits, axis=1)


if __name__ == "__main__":
    # Small shapes implied by the module: seq=8, batch=2, lstm_input_dims=4,
    # hidden_dims=32, classification head (3 classes), 1 LSTM layer.
    T, B, D, H, C = 8, 2, 4, 32, 3

    key = jax.random.PRNGKey(0)
    ks = jax.random.split(key, 6)

    # Deterministic, PyTorch-style initialization (synthetic, no checkpoint).
    k_lstm = 1.0 / jnp.sqrt(H)
    w_ih = jax.random.uniform(ks[0], (4 * H, D), jnp.float32, -k_lstm, k_lstm)
    w_hh = jax.random.uniform(ks[1], (4 * H, H), jnp.float32, -k_lstm, k_lstm)
    b_ih = jax.random.uniform(ks[2], (4 * H,), jnp.float32, -k_lstm, k_lstm)
    b_hh = jax.random.uniform(ks[3], (4 * H,), jnp.float32, -k_lstm, k_lstm)
    # fc1: xavier_uniform weight, zero bias (per weight_init).
    bound = jnp.sqrt(6.0 / (H + C))
    w_fc = jax.random.uniform(ks[4], (C, H), jnp.float32, -bound, bound)
    b_fc = jnp.zeros((C,), jnp.float32)

    stock_hist = jax.random.normal(ks[5], (T, B, D), jnp.float32)

    # One-time weight prep (init-time), not part of the per-call forward.
    params = prepare_params(w_ih, w_hh, b_ih, b_hh, w_fc, b_fc,
                            hidden=H, n_classes=C)
    params = jax.block_until_ready(params)

    preds = lstm_forward(stock_hist, params, hidden=H, n_classes=C)
    preds = jax.block_until_ready(preds)

    ref = _reference(stock_hist, w_ih, w_hh, b_ih, b_hh, w_fc, b_fc, H)
    assert preds.shape == (B, C)
    # Tolerance covers the bf16 MXU operands on the recurrent matmul
    # (f32 accumulate); the softmax itself is exact f32.
    assert jnp.allclose(preds, ref, atol=5e-3, rtol=5e-3), (preds, ref)

    print("KERNEL_OK")
</pallas_src>

<mosaic_0001>
module attributes {stable_mosaic.version = 11 : i64} {
  func.func @_lstm_head_kernel(%arg0: memref<64x8xf32, #tpu.memory_space<vmem>>, %arg1: memref<8x128xf32, #tpu.memory_space<vmem>>, %arg2: memref<32x128xbf16, #tpu.memory_space<vmem>>, %arg3: memref<1x128xf32, #tpu.memory_space<vmem>>, %arg4: memref<32x128xf32, #tpu.memory_space<vmem>>, %arg5: memref<1x128xf32, #tpu.memory_space<vmem>>, %arg6: memref<8x128xf32, #tpu.memory_space<vmem>>) attributes {dimension_semantics = [], scalar_prefetch = 0 : i64, scratch_operands = 0 : i64, tpu.core_type = #tpu.core_type<tc>} {
    %c0 = arith.constant 0 : index
    %c0_0 = arith.constant 0 : index
    %0 = vector.load %arg0[%c0, %c0_0] : memref<64x8xf32, #tpu.memory_space<vmem>>, vector<64x8xf32>
    %c0_1 = arith.constant 0 : index
    %c0_2 = arith.constant 0 : index
    %1 = vector.load %arg1[%c0_1, %c0_2] : memref<8x128xf32, #tpu.memory_space<vmem>>, vector<8x128xf32>
    %cst = arith.constant dense<0.000000e+00> : vector<64x128xf32>
    %2 = tpu.matmul %0, %1, %cst {dimension_numbers = #tpu.dot_dimension_numbers<[1], [0], [0], [1], [0, 0, 1, 1], [], []>} : vector<64x8xf32>, vector<8x128xf32>, vector<64x128xf32> -> vector<64x128xf32>
    %c0_3 = arith.constant 0 : index
    %c0_4 = arith.constant 0 : index
    %3 = vector.load %arg3[%c0_3, %c0_4] : memref<1x128xf32, #tpu.memory_space<vmem>>, vector<1x128xf32>
    %4 = vector.broadcast %3 : vector<1x128xf32> to vector<64x128xf32>
    %5 = arith.addf %2, %4 : vector<64x128xf32>
    %c0_5 = arith.constant 0 : index
    %c0_6 = arith.constant 0 : index
    %6 = vector.load %arg2[%c0_5, %c0_6] : memref<32x128xbf16, #tpu.memory_space<vmem>>, vector<32x128xbf16>
    %7 = vector.extract_strided_slice %5 {offsets = [0, 0], sizes = [8, 128], strides = [1, 1]} : vector<64x128xf32> to vector<8x128xf32>
    %cst_7 = arith.constant 0.000000e+00 : f32
    %8 = vector.broadcast %cst_7 : f32 to vector<8x32xf32>
    %9 = vector.extract_strided_slice %7 {offsets = [0, 0], sizes = [8, 96], strides = [1, 1]} : vector<8x128xf32> to vector<8x96xf32>
    %10 = arith.negf %9 : vector<8x96xf32>
    %11 = math.exp %10 : vector<8x96xf32>
    %cst_8 = arith.constant 1.000000e+00 : f32
    %12 = vector.broadcast %cst_8 : f32 to vector<8x96xf32>
    %13 = arith.addf %12, %11 : vector<8x96xf32>
    %14 = arith.divf %12, %13 : vector<8x96xf32>
    %15 = vector.extract_strided_slice %7 {offsets = [0, 96], sizes = [8, 32], strides = [1, 1]} : vector<8x128xf32> to vector<8x32xf32>
    %16 = math.tanh %15 : vector<8x32xf32>
    %17 = vector.extract_strided_slice %14 {offsets = [0, 0], sizes = [8, 32], strides = [1, 1]} : vector<8x96xf32> to vector<8x32xf32>
    %18 = vector.extract_strided_slice %14 {offsets = [0, 32], sizes = [8, 32], strides = [1, 1]} : vector<8x96xf32> to vector<8x32xf32>
    %19 = vector.extract_strided_slice %14 {offsets = [0, 64], sizes = [8, 32], strides = [1, 1]} : vector<8x96xf32> to vector<8x32xf32>
    %20 = arith.mulf %18, %8 : vector<8x32xf32>
    %21 = arith.mulf %17, %16 : vector<8x32xf32>
    %22 = arith.addf %20, %21 : vector<8x32xf32>
    %23 = math.tanh %22 : vector<8x32xf32>
    %24 = arith.mulf %19, %23 : vector<8x32xf32>
    %25 = vector.extract_strided_slice %5 {offsets = [8, 0], sizes = [8, 128], strides = [1, 1]} : vector<64x128xf32> to vector<8x128xf32>
    %26 = arith.truncf %24 : vector<8x32xf32> to vector<8x32xbf16>
    %cst_9 = arith.constant dense<0.000000e+00> : vector<8x128xf32>
    %27 = tpu.matmul %26, %6, %cst_9 {dimension_numbers = #tpu.dot_dimension_numbers<[1], [0], [0], [1], [0, 0, 1, 1], [], []>} : vector<8x32xbf16>, vector<32x128xbf16>, vector<8x128xf32> -> vector<8x128xf32>
    %28 = arith.addf %25, %27 : vector<8x128xf32>
    %29 = vector.extract_strided_slice %28 {offsets = [0, 0], sizes = [8, 96], strides = [1, 1]} : vector<8x128xf32> to vector<8x96xf32>
    %30 = arith.negf %29 : vector<8x96xf32>
    %31 = math.exp %30 : vector<8x96xf32>
    %cst_10 = arith.constant 1.000000e+00 : f32
    %32 = vector.broadcast %cst_10 : f32 to vector<8x96xf32>
    %33 = arith.addf %32, %31 : vector<8x96xf32>
    %34 = arith.divf %32, %33 : vector<8x96xf32>
    %35 = vector.extract_strided_slice %28 {offsets = [0, 96], sizes = [8, 32], strides = [1, 1]} : vector<8x128xf32> to vector<8x32xf32>
    %36 = math.tanh %35 : vector<8x32xf32>
    %37 = vector.extract_strided_slice %34 {offsets = [0, 0], sizes = [8, 32], strides = [1, 1]} : vector<8x96xf32> to vector<8x32xf32>
    %38 = vector.extract_strided_slice %34 {offsets = [0, 32], sizes = [8, 32], strides = [1, 1]} : vector<8x96xf32> to vector<8x32xf32>
    %39 = vector.extract_strided_slice %34 {offsets = [0, 64], sizes = [8, 32], strides = [1, 1]} : vector<8x96xf32> to vector<8x32xf32>
    %40 = arith.mulf %38, %22 : vector<8x32xf32>
    %41 = arith.mulf %37, %36 : vector<8x32xf32>
    %42 = arith.addf %40, %41 : vector<8x32xf32>
    %43 = math.tanh %42 : vector<8x32xf32>
    %44 = arith.mulf %39, %43 : vector<8x32xf32>
    %45 = vector.extract_strided_slice %5 {offsets = [16, 0], sizes = [8, 128], strides = [1, 1]} : vector<64x128xf32> to vector<8x128xf32>
    %46 = arith.truncf %44 : vector<8x32xf32> to vector<8x32xbf16>
    %cst_11 = arith.constant dense<0.000000e+00> : vector<8x128xf32>
    %47 = tpu.matmul %46, %6, %cst_11 {dimension_numbers = #tpu.dot_dimension_numbers<[1], [0], [0], [1], [0, 0, 1, 1], [], []>} : vector<8x32xbf16>, vector<32x128xbf16>, vector<8x128xf32> -> vector<8x128xf32>
    %48 = arith.addf %45, %47 : vector<8x128xf32>
    %49 = vector.extract_strided_slice %48 {offsets = [0, 0], sizes = [8, 96], strides = [1, 1]} : vector<8x128xf32> to vector<8x96xf32>
    %50 = arith.negf %49 : vector<8x96xf32>
    %51 = math.exp %50 : vector<8x96xf32>
    %cst_12 = arith.constant 1.000000e+00 : f32
    %52 = vector.broadcast %cst_12 : f32 to vector<8x96xf32>
    %53 = arith.addf %52, %51 : vector<8x96xf32>
    %54 = arith.divf %52, %53 : vector<8x96xf32>
    %55 = vector.extract_strided_slice %48 {offsets = [0, 96], sizes = [8, 32], strides = [1, 1]} : vector<8x128xf32> to vector<8x32xf32>
    %56 = math.tanh %55 : vector<8x32xf32>
    %57 = vector.extract_strided_slice %54 {offsets = [0, 0], sizes = [8, 32], strides = [1, 1]} : vector<8x96xf32> to vector<8x32xf32>
    %58 = vector.extract_strided_slice %54 {offsets = [0, 32], sizes = [8, 32], strides = [1, 1]} : vector<8x96xf32> to vector<8x32xf32>
    %59 = vector.extract_strided_slice %54 {offsets = [0, 64], sizes = [8, 32], strides = [1, 1]} : vector<8x96xf32> to vector<8x32xf32>
    %60 = arith.mulf %58, %42 : vector<8x32xf32>
    %61 = arith.mulf %57, %56 : vector<8x32xf32>
    %62 = arith.addf %60, %61 : vector<8x32xf32>
    %63 = math.tanh %62 : vector<8x32xf32>
    %64 = arith.mulf %59, %63 : vector<8x32xf32>
    %65 = vector.extract_strided_slice %5 {offsets = [24, 0], sizes = [8, 128], strides = [1, 1]} : vector<64x128xf32> to vector<8x128xf32>
    %66 = arith.truncf %64 : vector<8x32xf32> to vector<8x32xbf16>
    %cst_13 = arith.constant dense<0.000000e+00> : vector<8x128xf32>
    %67 = tpu.matmul %66, %6, %cst_13 {dimension_numbers = #tpu.dot_dimension_numbers<[1], [0], [0], [1], [0, 0, 1, 1], [], []>} : vector<8x32xbf16>, vector<32x128xbf16>, vector<8x128xf32> -> vector<8x128xf32>
    %68 = arith.addf %65, %67 : vector<8x128xf32>
    %69 = vector.extract_strided_slice %68 {offsets = [0, 0], sizes = [8, 96], strides = [1, 1]} : vector<8x128xf32> to vector<8x96xf32>
    %70 = arith.negf %69 : vector<8x96xf32>
    %71 = math.exp %70 : vector<8x96xf32>
    %cst_14 = arith.constant 1.000000e+00 : f32
    %72 = vector.broadcast %cst_14 : f32 to vector<8x96xf32>
    %73 = arith.addf %72, %71 : vector<8x96xf32>
    %74 = arith.divf %72, %73 : vector<8x96xf32>
    %75 = vector.extract_strided_slice %68 {offsets = [0, 96], sizes = [8, 32], strides = [1, 1]} : vector<8x128xf32> to vector<8x32xf32>
    %76 = math.tanh %75 : vector<8x32xf32>
    %77 = vector.extract_strided_slice %74 {offsets = [0, 0], sizes = [8, 32], strides = [1, 1]} : vector<8x96xf32> to vector<8x32xf32>
    %78 = vector.extract_strided_slice %74 {offsets = [0, 32], sizes = [8, 32], strides = [1, 1]} : vector<8x96xf32> to vector<8x32xf32>
    %79 = vector.extract_strided_slice %74 {offsets = [0, 64], sizes = [8, 32], strides = [1, 1]} : vector<8x96xf32> to vector<8x32xf32>
    %80 = arith.mulf %78, %62 : vector<8x32xf32>
    %81 = arith.mulf %77, %76 : vector<8x32xf32>
    %82 = arith.addf %80, %81 : vector<8x32xf32>
    %83 = math.tanh %82 : vector<8x32xf32>
    %84 = arith.mulf %79, %83 : vector<8x32xf32>
    %85 = vector.extract_strided_slice %5 {offsets = [32, 0], sizes = [8, 128], strides = [1, 1]} : vector<64x128xf32> to vector<8x128xf32>
    %86 = arith.truncf %84 : vector<8x32xf32> to vector<8x32xbf16>
    %cst_15 = arith.constant dense<0.000000e+00> : vector<8x128xf32>
    %87 = tpu.matmul %86, %6, %cst_15 {dimension_numbers = #tpu.dot_dimension_numbers<[1], [0], [0], [1], [0, 0, 1, 1], [], []>} : vector<8x32xbf16>, vector<32x128xbf16>, vector<8x128xf32> -> vector<8x128xf32>
    %88 = arith.addf %85, %87 : vector<8x128xf32>
    %89 = vector.extract_strided_slice %88 {offsets = [0, 0], sizes = [8, 96], strides = [1, 1]} : vector<8x128xf32> to vector<8x96xf32>
    %90 = arith.negf %89 : vector<8x96xf32>
    %91 = math.exp %90 : vector<8x96xf32>
    %cst_16 = arith.constant 1.000000e+00 : f32
    %92 = vector.broadcast %cst_16 : f32 to vector<8x96xf32>
    %93 = arith.addf %92, %91 : vector<8x96xf32>
    %94 = arith.divf %92, %93 : vector<8x96xf32>
    %95 = vector.extract_strided_slice %88 {offsets = [0, 96], sizes = [8, 32], strides = [1, 1]} : vector<8x128xf32> to vector<8x32xf32>
    %96 = math.tanh %95 : vector<8x32xf32>
    %97 = vector.extract_strided_slice %94 {offsets = [0, 0], sizes = [8, 32], strides = [1, 1]} : vector<8x96xf32> to vector<8x32xf32>
    %98 = vector.extract_strided_slice %94 {offsets = [0, 32], sizes = [8, 32], strides = [1, 1]} : vector<8x96xf32> to vector<8x32xf32>
    %99 = vector.extract_strided_slice %94 {offsets = [0, 64], sizes = [8, 32], strides = [1, 1]} : vector<8x96xf32> to vector<8x32xf32>
    %100 = arith.mulf %98, %82 : vector<8x32xf32>
    %101 = arith.mulf %97, %96 : vector<8x32xf32>
    %102 = arith.addf %100, %101 : vector<8x32xf32>
    %103 = math.tanh %102 : vector<8x32xf32>
    %104 = arith.mulf %99, %103 : vector<8x32xf32>
    %105 = vector.extract_strided_slice %5 {offsets = [40, 0], sizes = [8, 128], strides = [1, 1]} : vector<64x128xf32> to vector<8x128xf32>
    %106 = arith.truncf %104 : vector<8x32xf32> to vector<8x32xbf16>
    %cst_17 = arith.constant dense<0.000000e+00> : vector<8x128xf32>
    %107 = tpu.matmul %106, %6, %cst_17 {dimension_numbers = #tpu.dot_dimension_numbers<[1], [0], [0], [1], [0, 0, 1, 1], [], []>} : vector<8x32xbf16>, vector<32x128xbf16>, vector<8x128xf32> -> vector<8x128xf32>
    %108 = arith.addf %105, %107 : vector<8x128xf32>
    %109 = vector.extract_strided_slice %108 {offsets = [0, 0], sizes = [8, 96], strides = [1, 1]} : vector<8x128xf32> to vector<8x96xf32>
    %110 = arith.negf %109 : vector<8x96xf32>
    %111 = math.exp %110 : vector<8x96xf32>
    %cst_18 = arith.constant 1.000000e+00 : f32
    %112 = vector.broadcast %cst_18 : f32 to vector<8x96xf32>
    %113 = arith.addf %112, %111 : vector<8x96xf32>
    %114 = arith.divf %112, %113 : vector<8x96xf32>
    %115 = vector.extract_strided_slice %108 {offsets = [0, 96], sizes = [8, 32], strides = [1, 1]} : vector<8x128xf32> to vector<8x32xf32>
    %116 = math.tanh %115 : vector<8x32xf32>
    %117 = vector.extract_strided_slice %114 {offsets = [0, 0], sizes = [8, 32], strides = [1, 1]} : vector<8x96xf32> to vector<8x32xf32>
    %118 = vector.extract_strided_slice %114 {offsets = [0, 32], sizes = [8, 32], strides = [1, 1]} : vector<8x96xf32> to vector<8x32xf32>
    %119 = vector.extract_strided_slice %114 {offsets = [0, 64], sizes = [8, 32], strides = [1, 1]} : vector<8x96xf32> to vector<8x32xf32>
    %120 = arith.mulf %118, %102 : vector<8x32xf32>
    %121 = arith.mulf %117, %116 : vector<8x32xf32>
    %122 = arith.addf %120, %121 : vector<8x32xf32>
    %123 = math.tanh %122 : vector<8x32xf32>
    %124 = arith.mulf %119, %123 : vector<8x32xf32>
    %125 = vector.extract_strided_slice %5 {offsets = [48, 0], sizes = [8, 128], strides = [1, 1]} : vector<64x128xf32> to vector<8x128xf32>
    %126 = arith.truncf %124 : vector<8x32xf32> to vector<8x32xbf16>
    %cst_19 = arith.constant dense<0.000000e+00> : vector<8x128xf32>
    %127 = tpu.matmul %126, %6, %cst_19 {dimension_numbers = #tpu.dot_dimension_numbers<[1], [0], [0], [1], [0, 0, 1, 1], [], []>} : vector<8x32xbf16>, vector<32x128xbf16>, vector<8x128xf32> -> vector<8x128xf32>
    %128 = arith.addf %125, %127 : vector<8x128xf32>
    %129 = vector.extract_strided_slice %128 {offsets = [0, 0], sizes = [8, 96], strides = [1, 1]} : vector<8x128xf32> to vector<8x96xf32>
    %130 = arith.negf %129 : vector<8x96xf32>
    %131 = math.exp %130 : vector<8x96xf32>
    %cst_20 = arith.constant 1.000000e+00 : f32
    %132 = vector.broadcast %cst_20 : f32 to vector<8x96xf32>
    %133 = arith.addf %132, %131 : vector<8x96xf32>
    %134 = arith.divf %132, %133 : vector<8x96xf32>
    %135 = vector.extract_strided_slice %128 {offsets = [0, 96], sizes = [8, 32], strides = [1, 1]} : vector<8x128xf32> to vector<8x32xf32>
    %136 = math.tanh %135 : vector<8x32xf32>
    %137 = vector.extract_strided_slice %134 {offsets = [0, 0], sizes = [8, 32], strides = [1, 1]} : vector<8x96xf32> to vector<8x32xf32>
    %138 = vector.extract_strided_slice %134 {offsets = [0, 32], sizes = [8, 32], strides = [1, 1]} : vector<8x96xf32> to vector<8x32xf32>
    %139 = vector.extract_strided_slice %134 {offsets = [0, 64], sizes = [8, 32], strides = [1, 1]} : vector<8x96xf32> to vector<8x32xf32>
    %140 = arith.mulf %138, %122 : vector<8x32xf32>
    %141 = arith.mulf %137, %136 : vector<8x32xf32>
    %142 = arith.addf %140, %141 : vector<8x32xf32>
    %143 = math.tanh %142 : vector<8x32xf32>
    %144 = arith.mulf %139, %143 : vector<8x32xf32>
    %145 = vector.extract_strided_slice %5 {offsets = [56, 0], sizes = [8, 128], strides = [1, 1]} : vector<64x128xf32> to vector<8x128xf32>
    %146 = arith.truncf %144 : vector<8x32xf32> to vector<8x32xbf16>
    %cst_21 = arith.constant dense<0.000000e+00> : vector<8x128xf32>
    %147 = tpu.matmul %146, %6, %cst_21 {dimension_numbers = #tpu.dot_dimension_numbers<[1], [0], [0], [1], [0, 0, 1, 1], [], []>} : vector<8x32xbf16>, vector<32x128xbf16>, vector<8x128xf32> -> vector<8x128xf32>
    %148 = arith.addf %145, %147 : vector<8x128xf32>
    %149 = vector.extract_strided_slice %148 {offsets = [0, 0], sizes = [8, 96], strides = [1, 1]} : vector<8x128xf32> to vector<8x96xf32>
    %150 = arith.negf %149 : vector<8x96xf32>
    %151 = math.exp %150 : vector<8x96xf32>
    %cst_22 = arith.constant 1.000000e+00 : f32
    %152 = vector.broadcast %cst_22 : f32 to vector<8x96xf32>
    %153 = arith.addf %152, %151 : vector<8x96xf32>
    %154 = arith.divf %152, %153 : vector<8x96xf32>
    %155 = vector.extract_strided_slice %148 {offsets = [0, 96], sizes = [8, 32], strides = [1, 1]} : vector<8x128xf32> to vector<8x32xf32>
    %156 = math.tanh %155 : vector<8x32xf32>
    %157 = vector.extract_strided_slice %154 {offsets = [0, 0], sizes = [8, 32], strides = [1, 1]} : vector<8x96xf32> to vector<8x32xf32>
    %158 = vector.extract_strided_slice %154 {offsets = [0, 32], sizes = [8, 32], strides = [1, 1]} : vector<8x96xf32> to vector<8x32xf32>
    %159 = vector.extract_strided_slice %154 {offsets = [0, 64], sizes = [8, 32], strides = [1, 1]} : vector<8x96xf32> to vector<8x32xf32>
    %160 = arith.mulf %158, %142 : vector<8x32xf32>
    %161 = arith.mulf %157, %156 : vector<8x32xf32>
    %162 = arith.addf %160, %161 : vector<8x32xf32>
    %163 = math.tanh %162 : vector<8x32xf32>
    %164 = arith.mulf %159, %163 : vector<8x32xf32>
    %c0_23 = arith.constant 0 : index
    %c0_24 = arith.constant 0 : index
    %165 = vector.load %arg4[%c0_23, %c0_24] : memref<32x128xf32, #tpu.memory_space<vmem>>, vector<32x128xf32>
    %cst_25 = arith.constant dense<0.000000e+00> : vector<8x128xf32>
    %166 = tpu.matmul %164, %165, %cst_25 {dimension_numbers = #tpu.dot_dimension_numbers<[1], [0], [0], [1], [0, 0, 1, 1], [], []>} : vector<8x32xf32>, vector<32x128xf32>, vector<8x128xf32> -> vector<8x128xf32>
    %c0_26 = arith.constant 0 : index
    %c0_27 = arith.constant 0 : index
    %167 = vector.load %arg5[%c0_26, %c0_27] : memref<1x128xf32, #tpu.memory_space<vmem>>, vector<1x128xf32>
    %168 = vector.broadcast %167 : vector<1x128xf32> to vector<8x128xf32>
    %169 = arith.addf %166, %168 : vector<8x128xf32>
    %cst_28 = arith.constant dense<0xFF800000> : vector<8xf32>
    %170 = vector.multi_reduction <maximumf>, %169, %cst_28 [1] : vector<8x128xf32> to vector<8xf32>
    %171 = vector.shape_cast %170 : vector<8xf32> to vector<8x1xf32>
    %172 = vector.broadcast %171 : vector<8x1xf32> to vector<8x128xf32>
    %173 = arith.subf %169, %172 : vector<8x128xf32>
    %174 = math.exp %173 : vector<8x128xf32>
    %cst_29 = arith.constant dense<0.000000e+00> : vector<8xf32>
    %175 = vector.multi_reduction <add>, %174, %cst_29 [1] : vector<8x128xf32> to vector<8xf32>
    %176 = vector.shape_cast %175 : vector<8xf32> to vector<8x1xf32>
    %177 = vector.broadcast %176 : vector<8x1xf32> to vector<8x128xf32>
    %178 = arith.divf %174, %177 : vector<8x128xf32>
    %c0_30 = arith.constant 0 : index
    %c0_31 = arith.constant 0 : index
    %179 = vector.load %arg6[%c0_30, %c0_31] : memref<8x128xf32, #tpu.memory_space<vmem>>, vector<8x128xf32>
    tpu.vector_store %arg6[%c0_30, %c0_31], %178 {strides = array<i32>} : memref<8x128xf32, #tpu.memory_space<vmem>>, vector<8x128xf32>,
    return
  }
}

</mosaic_0001>

<bundles_post_ra>
// kernel: lstm_forward.1
= control target key start
LH: loop header
LB: loop body
LE: loop exit
PB: predicated region body
PF: predicated region fallthrough
CT: control target
= control target key end

     0   :  { %vm40_vm0 = vcmask 64512   ;;  %v1034_v17 = vmov 0.0   ;;  %vm1035_vm1 = vmmov 0   ;;  %vm214_vm2 = vcmask 261120   ;;  %s1245_s1 = inlined_call_operand.vmem [shape: f32[8,128], index: 1, kind: input, shape index: {}]   ;;  %s1246_s0 = inlined_call_operand.vmem [shape: f32[64,8], index: 0, kind: input, shape index: {}]   ;;  %s1247_s3 = inlined_call_operand.vmem [shape: f32[1,128], index: 3, kind: input, shape index: {}]   ;;  %s1248_s2 = inlined_call_operand.vmem [shape: bf16[32,128], index: 2, kind: input, shape index: {}]   ;;  %s1249_s4 = inlined_call_operand.vmem [shape: f32[32,128], index: 4, kind: input, shape index: {}]   ;;  %s1250_s5 = inlined_call_operand.vmem [shape: f32[1,128], index: 5, kind: input, shape index: {}]   ;;  %s1251_s6 = inlined_call_operand.vmem [shape: f32[8,128], index: 6, kind: output, shape index: {}]  }
   0x1   :  { %v32_v0 = vld [vmem:[%s1245_s1] sm:$0xff]  ;;  %v25_v2 = vld [vmem:[%s1246_s0 + $0x8] sm:$0xff]  ;;  %s1033_s1 = smov 32   ;;  %892 = vmatprep.subr.bf16.mxu1 %v1034_v17  ;;  %896 = vmatprep.mubr.msk.bf16.mxu1 %vm1035_vm1, %v1034_v17  ;;  %v26_v41 = vld [vmem:[%s1246_s0 + $0x10] sm:$0xff] }
   0x2   :  { %v24_v1 = vld [vmem:[%s1246_s0] sm:$0xff]  ;;  %878 = vmatprep.subr.mxu0 %v32_v0  ;;  %v1095_v18 = vld [vmem:[%s1248_s2 + $0x8] sm:$0xff]   ;;  %v27_v42 = vld [vmem:[%s1246_s0 + $0x18] sm:$0xff] }
   0x3   :  { %880 = vmatprep.mubr.msk.f32.mxu0 %vm40_vm0, %v24_v1  ;;  %879 = vmatpush3.msra.mxu0 %v32_v0  ;;  %v1086_v4 = vld [vmem:[%s1247_s3] ss:$0 sm:$0xff] }
   0x4   :  { %881 = vmatmul.mubr.msk.f32.vlgmr.msra.gmra.mxu0 %vm40_vm0, %v25_v2  ;;  %908 = vmatprep.subr.bf16.mxu0 %v1034_v17  ;;  %v1104_v19 = vld [vmem:[%s1248_s2] sm:$0xff]   ;;  %s1036_s2 = smov 64  }
   0x5   :  { %893 = vmatpush3.bf16.msra.mxu1 %v1095_v18  ;;  %909 = vmatpush3.bf16.msra.mxu0 %v1095_v18  ;;  %v28_v2 = vld [vmem:[%s1246_s0 + $0x20] sm:$0xff] }
   0x6   :  { %894 = vmatprep.subr.bf16.mxu1 %v1034_v17  ;;  %910 = vmatprep.subr.bf16.mxu0 %v1034_v17 }
   0x7   :  { %883 = vmatprep.mubr.msk.f32.mxu0 %vm40_vm0, %v26_v41 }
   0x8   :  { %884 = vmatmul.mubr.msk.f32.gmra.mxu0 %vm40_vm0, %v27_v42 }
   0x9   :  { %895 = vmatpush3.bf16.msra.mxu1 %v1104_v19  ;;  %911 = vmatpush3.bf16.msra.mxu0 %v1104_v19 }
   0xa   :  { %900 = vmatprep.subr.bf16.mxu1 %v1034_v17  ;;  %924 = vmatprep.subr.bf16.mxu0 %v1034_v17 }
   0xb   :  { %886 = vmatprep.mubr.msk.f32.mxu0 %vm40_vm0, %v28_v2 }
  0xc4   :  { %v882_v3 = vpop.f32.mrf.mxu0 }
  0xc5   :  { %v137_v25 = vadd.f32 %v882_v3, %v1086_v4  ;;  %v29_v3 = vld [vmem:[%s1246_s0 + $0x28] sm:$0xff] }
  0xc6   :  { %v131_v5 = vpop.f32.mrf.mxu0  ;;  %887 = vmatmul.mubr.msk.f32.gmra.mxu0 %vm40_vm0, %v29_v3 }
  0xc7   :  { %v132_v6 = vadd.f32 %v1086_v4, %v131_v5  ;;  %v30_v5 = vld [vmem:[%s1246_s0 + $0x30] sm:$0xff] }
  0xc8   :  { %v885_v48 = vpop.f32.mrf.mxu0  ;;  %889 = vmatprep.mubr.msk.f32.mxu0 %vm40_vm0, %v30_v5 }
  0xc9   :  { %965 = vtanh.f32 %v132_v6  ;;  %v824_v8 = vmul.f32 -1.442695, %v132_v6  ;;  %v31_v6 = vld [vmem:[%s1246_s0 + $0x38] sm:$0xff] }
  0xca   :  { %v141_v49 = vpop.f32.mrf.mxu0  ;;  %890 = vmatmul.mubr.msk.f32.gmra.mxu0 %vm40_vm0, %v31_v6 }
  0xcb   :  { %967 = vpow2.f32 %v824_v8  ;;  %v142_v50 = vadd.f32 %v1086_v4, %v141_v49  ;;  %912 = vmatprep.mubr.msk.bf16.mxu0 %vm1035_vm1, %v1034_v17 }
  0xd6   :  { %v966_v7 = vpop.eup %965 }
  0xd7   :  { %183 = vrot.lane.b32.xlu0 %v966_v7, %s1033_s1 }
  0xd8   :  { %v968_v9 = vpop.eup %967 }
  0xd9   :  { %v177_v10 = vadd.f32 1.0, %v968_v9 }
  0xdb   :  { %969 = vrcp.f32 %v177_v10 }
  0xe8   :  { %v970_v11 = vpop.eup %969 }
  0xe9   :  { %v181_v14 = vmul.f32 0.0, %v970_v11 }
 0x149   :  { %v184_v12 = vpop.permute.xlu0 %183 }
 0x14a   :  { %v186_v13 = vmul.f32 %v970_v11, %v184_v12 }
 0x14c   :  { %188 = vrot.lane.b32.xlu0 %v186_v13, %s1033_s1 }
 0x186   :  { %v1172_v12 = vpop.f32.mrf.mxu0 }
 0x188   :  { %v151_v13 = vpop.f32.mrf.mxu0 }
 0x1be   :  { %v189_v15 = vpop.permute.xlu0 %188 }
 0x1bf   :  { %v191_v16 = vadd.f32 %v189_v15, %v181_v14  ;;  %v1174_v14 = vpop.f32.mrf.mxu0 }
 0x1c1   :  { %971 = vtanh.f32 %v191_v16  ;;  %v1176_v15 = vpop.f32.mrf.mxu0 }
 0x1ce   :  { %v972_v20 = vpop.eup %971 }
 0x1cf   :  { %194 = vrot.lane.b32.xlu1 %v972_v20, %s1033_s1 }
 0x241   :  { %v195_v21 = vpop.permute.xlu1 %194 }
 0x242   :  { %v197_v22 = vmul.f32 %v970_v11, %v195_v21 }
 0x244   :  { %v198_v23 = vpack.c.bf16 %v197_v22, %v197_v22 }
 0x246   :  { %200 = vrot.lane.b32.xlu1 %v198_v23, %s1036_s2 }
 0x2b8   :  { %v201_v24 = vpop.permute.xlu1 %200 }
 0x2b9   :  { %897 = vmatmul.mubr.msk.bf16.vlgmr.msra.gmra.mxu1 %vm214_vm2, %v201_v24 }
 0x2ba   :  { %901 = vmatpush3.bf16.msra.mxu1 %v1095_v18  ;;  %904 = vmatprep.mubr.msk.bf16.mxu1 %vm1035_vm1, %v1034_v17 }
 0x2bb   :  { %902 = vmatprep.subr.bf16.mxu1 %v1034_v17 }
 0x2be   :  { %903 = vmatpush3.bf16.msra.mxu1 %v1104_v19 }
 0x2bf   :  { %916 = vmatprep.subr.bf16.mxu1 %v1034_v17 }
 0x379   :  { %v252_v26 = vpop.f32.mrf.mxu1 }
 0x37a   :  { %v258_v27 = vadd.f32 %v252_v26, %v137_v25 }
 0x37b   :  { %v898_v28 = vpop.f32.mrf.mxu1 }
 0x37c   :  { %973 = vtanh.f32 %v258_v27  ;;  %v828_v32 = vmul.f32 -1.442695, %v258_v27 }
 0x37d   :  { %v255_v29 = vpop.f32.mrf.mxu1 }
 0x37e   :  { %975 = vpow2.f32 %v828_v32 }
 0x37f   :  { %v899_v30 = vpop.f32.mrf.mxu1 }
 0x389   :  { %v974_v31 = vpop.eup %973 }
 0x38a   :  { %268 = vrot.lane.b32.xlu0 %v974_v31, %s1033_s1 }
 0x38b   :  { %v976_v33 = vpop.eup %975 }
 0x38c   :  { %v262_v34 = vadd.f32 1.0, %v976_v33 }
 0x38e   :  { %977 = vrcp.f32 %v262_v34 }
 0x39b   :  { %v978_v35 = vpop.eup %977 }
 0x39c   :  { %v266_v38 = vmul.f32 %v978_v35, %v191_v16  ;;  %v147_v16 = vadd.f32 %v885_v48, %v1086_v4 }
 0x3fc   :  { %v269_v36 = vpop.permute.xlu0 %268 }
 0x3fd   :  { %v271_v37 = vmul.f32 %v978_v35, %v269_v36 }
 0x3ff   :  { %273 = vrot.lane.b32.xlu1 %v271_v37, %s1033_s1 }
 0x471   :  { %v274_v39 = vpop.permute.xlu1 %273 }
 0x472   :  { %v276_v40 = vadd.f32 %v274_v39, %v266_v38 }
 0x474   :  { %979 = vtanh.f32 %v276_v40 }
 0x481   :  { %v980_v43 = vpop.eup %979 }
 0x482   :  { %279 = vrot.lane.b32.xlu0 %v980_v43, %s1033_s1 }
 0x4f4   :  { %v280_v44 = vpop.permute.xlu0 %279 }
 0x4f5   :  { %v282_v45 = vmul.f32 %v978_v35, %v280_v44 }
 0x4f7   :  { %v283_v46 = vpack.c.bf16 %v282_v45, %v282_v45 }
 0x4f9   :  { %285 = vrot.lane.b32.xlu1 %v283_v46, %s1036_s2 }
 0x56b   :  { %v286_v47 = vpop.permute.xlu1 %285 }
 0x56c   :  { %905 = vmatmul.mubr.msk.bf16.vlgmr.msra.gmra.mxu1 %vm214_vm2, %v286_v47 }
 0x56d   :  { %917 = vmatpush3.bf16.msra.mxu1 %v1095_v18  ;;  %920 = vmatprep.mubr.msk.bf16.mxu1 %vm1035_vm1, %v1034_v17 }
 0x56e   :  { %918 = vmatprep.subr.bf16.mxu1 %v1034_v17 }
 0x571   :  { %919 = vmatpush3.bf16.msra.mxu1 %v1104_v19 }
 0x572   :  { %932 = vmatprep.subr.bf16.mxu1 %v1034_v17 }
 0x62c   :  { %v324_v51 = vpop.f32.mrf.mxu1 }
 0x62d   :  { %v330_v52 = vadd.f32 %v324_v51, %v142_v50 }
 0x62e   :  { %v906_v53 = vpop.f32.mrf.mxu1 }
 0x62f   :  { %981 = vtanh.f32 %v330_v52  ;;  %v830_v57 = vmul.f32 -1.442695, %v330_v52 }
 0x630   :  { %v327_v54 = vpop.f32.mrf.mxu1 }
 0x631   :  { %983 = vpow2.f32 %v830_v57 }
 0x632   :  { %v907_v55 = vpop.f32.mrf.mxu1 }
 0x63c   :  { %v982_v56 = vpop.eup %981 }
 0x63d   :  { %340 = vrot.lane.b32.xlu0 %v982_v56, %s1033_s1 }
 0x63e   :  { %v984_v58 = vpop.eup %983 }
 0x63f   :  { %v334_v59 = vadd.f32 1.0, %v984_v58 }
 0x641   :  { %985 = vrcp.f32 %v334_v59 }
 0x64e   :  { %v986_v60 = vpop.eup %985 }
 0x64f   :  { %v338_v63 = vmul.f32 %v986_v60, %v276_v40  ;;  %v152_v40 = vadd.f32 %v1086_v4, %v151_v13 }
 0x6af   :  { %v341_v61 = vpop.permute.xlu0 %340 }
 0x6b0   :  { %v343_v62 = vmul.f32 %v986_v60, %v341_v61  ;;  %v157_v61 = vadd.f32 %v1172_v12, %v1086_v4 }
 0x6b2   :  { %345 = vrot.lane.b32.xlu1 %v343_v62, %s1033_s1 }
 0x724   :  { %v346_v0 = vpop.permute.xlu1 %345 }
 0x725   :  { %v348_v1 = vadd.f32 %v346_v0, %v338_v63 }
 0x727   :  { %987 = vtanh.f32 %v348_v1 }
 0x734   :  { %v988_v7 = vpop.eup %987 }
 0x735   :  { %351 = vrot.lane.b32.xlu0 %v988_v7, %s1033_s1 }
 0x7a7   :  { %v352_v8 = vpop.permute.xlu0 %351 }
 0x7a8   :  { %v354_v9 = vmul.f32 %v986_v60, %v352_v8 }
 0x7aa   :  { %v355_v10 = vpack.c.bf16 %v354_v9, %v354_v9 }
 0x7ac   :  { %357 = vrot.lane.b32.xlu1 %v355_v10, %s1036_s2 }
 0x81e   :  { %v358_v11 = vpop.permute.xlu1 %357 }
 0x81f   :  { %913 = vmatmul.mubr.msk.bf16.vlgmr.msra.gmra.mxu0 %vm214_vm2, %v358_v11 }
 0x820   :  { %925 = vmatpush3.bf16.msra.mxu0 %v1095_v18  ;;  %928 = vmatprep.mubr.msk.bf16.mxu0 %vm1035_vm1, %v1034_v17 }
 0x821   :  { %926 = vmatprep.subr.bf16.mxu0 %v1034_v17 }
 0x824   :  { %927 = vmatpush3.bf16.msra.mxu0 %v1104_v19 }
 0x825   :  { %940 = vmatprep.subr.bf16.mxu0 %v1034_v17 }
 0x8df   :  { %v396_v20 = vpop.f32.mrf.mxu0 }
 0x8e0   :  { %v402_v21 = vadd.f32 %v396_v20, %v147_v16 }
 0x8e1   :  { %v914_v22 = vpop.f32.mrf.mxu0 }
 0x8e2   :  { %989 = vtanh.f32 %v402_v21  ;;  %v832_v26 = vmul.f32 -1.442695, %v402_v21  ;;  %v162_v22 = vadd.f32 %v1086_v4, %v1176_v15 }
 0x8e3   :  { %v399_v23 = vpop.f32.mrf.mxu0 }
 0x8e4   :  { %991 = vpow2.f32 %v832_v26 }
 0x8e5   :  { %v915_v24 = vpop.f32.mrf.mxu0 }
 0x8ef   :  { %v990_v25 = vpop.eup %989 }
 0x8f0   :  { %412 = vrot.lane.b32.xlu0 %v990_v25, %s1033_s1 }
 0x8f1   :  { %v992_v27 = vpop.eup %991 }
 0x8f2   :  { %v406_v28 = vadd.f32 1.0, %v992_v27 }
 0x8f4   :  { %993 = vrcp.f32 %v406_v28 }
 0x901   :  { %v994_v29 = vpop.eup %993 }
 0x902   :  { %v410_v32 = vmul.f32 %v994_v29, %v348_v1 }
 0x962   :  { %v413_v30 = vpop.permute.xlu0 %412 }
 0x963   :  { %v415_v31 = vmul.f32 %v994_v29, %v413_v30 }
 0x965   :  { %417 = vrot.lane.b32.xlu1 %v415_v31, %s1033_s1 }
 0x9d7   :  { %v418_v33 = vpop.permute.xlu1 %417 }
 0x9d8   :  { %v420_v34 = vadd.f32 %v418_v33, %v410_v32 }
 0x9da   :  { %995 = vtanh.f32 %v420_v34 }
 0x9e7   :  { %v996_v35 = vpop.eup %995 }
 0x9e8   :  { %423 = vrot.lane.b32.xlu0 %v996_v35, %s1033_s1 }
 0xa5a   :  { %v424_v36 = vpop.permute.xlu0 %423 }
 0xa5b   :  { %v426_v37 = vmul.f32 %v994_v29, %v424_v36 }
 0xa5d   :  { %v427_v38 = vpack.c.bf16 %v426_v37, %v426_v37 }
 0xa5f   :  { %429 = vrot.lane.b32.xlu1 %v427_v38, %s1036_s2 }
 0xad1   :  { %v430_v39 = vpop.permute.xlu1 %429 }
 0xad2   :  { %921 = vmatmul.mubr.msk.bf16.vlgmr.msra.gmra.mxu1 %vm214_vm2, %v430_v39 }
 0xad3   :  { %933 = vmatpush3.bf16.msra.mxu1 %v1095_v18  ;;  %936 = vmatprep.mubr.msk.bf16.mxu1 %vm1035_vm1, %v1034_v17 }
 0xad4   :  { %934 = vmatprep.subr.bf16.mxu1 %v1034_v17 }
 0xad7   :  { %935 = vmatpush3.bf16.msra.mxu1 %v1104_v19 }
 0xad8   :  { %948 = vmatprep.subr.mxu1 %v1034_v17 }
 0xb92   :  { %v468_v41 = vpop.f32.mrf.mxu1 }
 0xb93   :  { %v474_v42 = vadd.f32 %v468_v41, %v152_v40 }
 0xb94   :  { %v922_v43 = vpop.f32.mrf.mxu1 }
 0xb95   :  { %997 = vtanh.f32 %v474_v42  ;;  %v834_v47 = vmul.f32 -1.442695, %v474_v42  ;;  %v167_v42 = vadd.f32 %v1174_v14, %v1086_v4 }
 0xb96   :  { %v471_v44 = vpop.f32.mrf.mxu1 }
 0xb97   :  { %999 = vpow2.f32 %v834_v47 }
 0xb98   :  { %v923_v45 = vpop.f32.mrf.mxu1 }
 0xba2   :  { %v998_v46 = vpop.eup %997 }
 0xba3   :  { %484 = vrot.lane.b32.xlu0 %v998_v46, %s1033_s1 }
 0xba4   :  { %v1000_v48 = vpop.eup %999 }
 0xba5   :  { %v478_v49 = vadd.f32 1.0, %v1000_v48 }
 0xba7   :  { %1001 = vrcp.f32 %v478_v49 }
 0xbb4   :  { %v1002_v50 = vpop.eup %1001 }
 0xbb5   :  { %v482_v53 = vmul.f32 %v1002_v50, %v420_v34 }
 0xc15   :  { %v485_v51 = vpop.permute.xlu0 %484 }
 0xc16   :  { %v487_v52 = vmul.f32 %v1002_v50, %v485_v51 }
 0xc18   :  { %489 = vrot.lane.b32.xlu1 %v487_v52, %s1033_s1 }
 0xc8a   :  { %v490_v54 = vpop.permute.xlu1 %489 }
 0xc8b   :  { %v492_v55 = vadd.f32 %v490_v54, %v482_v53 }
 0xc8d   :  { %1003 = vtanh.f32 %v492_v55 }
 0xc9a   :  { %v1004_v56 = vpop.eup %1003 }
 0xc9b   :  { %495 = vrot.lane.b32.xlu0 %v1004_v56, %s1033_s1  ;;  %v718_v56 = vld [vmem:[%s1249_s4 + $0x18] sm:$0xff] }
 0xd0d   :  { %v496_v57 = vpop.permute.xlu0 %495 }
 0xd0e   :  { %v498_v58 = vmul.f32 %v1002_v50, %v496_v57  ;;  %v717_v57 = vld [vmem:[%s1249_s4 + $0x10] sm:$0xff] }
 0xd10   :  { %v499_v59 = vpack.c.bf16 %v498_v58, %v498_v58  ;;  %v716_v58 = vld [vmem:[%s1249_s4 + $0x8] sm:$0xff] }
 0xd12   :  { %501 = vrot.lane.b32.xlu1 %v499_v59, %s1036_s2  ;;  %v715_v59 = vld [vmem:[%s1249_s4] sm:$0xff] }
 0xd84   :  { %v502_v60 = vpop.permute.xlu1 %501 }
 0xd85   :  { %929 = vmatmul.mubr.msk.bf16.vlgmr.msra.gmra.mxu0 %vm214_vm2, %v502_v60 }
 0xd86   :  { %941 = vmatpush3.bf16.msra.mxu0 %v1095_v18  ;;  %944 = vmatprep.mubr.msk.bf16.mxu0 %vm1035_vm1, %v1034_v17 }
 0xd87   :  { %942 = vmatprep.subr.bf16.mxu0 %v1034_v17 }
 0xd8a   :  { %943 = vmatpush3.bf16.msra.mxu0 %v1104_v19 }
 0xe45   :  { %v540_v62 = vpop.f32.mrf.mxu0 }
 0xe46   :  { %v546_v63 = vadd.f32 %v540_v62, %v157_v61 }
 0xe47   :  { %v930_v0 = vpop.f32.mrf.mxu0 }
 0xe48   :  { %1005 = vtanh.f32 %v546_v63  ;;  %v836_v18 = vmul.f32 -1.442695, %v546_v63  ;;  %v841_v0 = vld [vmem:[%s1250_s5] ss:$0 sm:$0xff] }
 0xe49   :  { %v543_v1 = vpop.f32.mrf.mxu0 }
 0xe4a   :  { %1007 = vpow2.f32 %v836_v18 }
 0xe4b   :  { %v931_v2 = vpop.f32.mrf.mxu0 }
 0xe55   :  { %v1006_v3 = vpop.eup %1005 }
 0xe56   :  { %556 = vrot.lane.b32.xlu0 %v1006_v3, %s1033_s1 }
 0xe57   :  { %v1008_v5 = vpop.eup %1007 }
 0xe58   :  { %v550_v6 = vadd.f32 1.0, %v1008_v5 }
 0xe5a   :  { %1009 = vrcp.f32 %v550_v6 }
 0xe67   :  { %v1010_v7 = vpop.eup %1009 }
 0xe68   :  { %v554_v9 = vmul.f32 %v1010_v7, %v492_v55 }
 0xec8   :  { %v557_v8 = vpop.permute.xlu0 %556 }
 0xec9   :  { %v559_v19 = vmul.f32 %v1010_v7, %v557_v8 }
 0xecb   :  { %561 = vrot.lane.b32.xlu1 %v559_v19, %s1033_s1 }
 0xf3d   :  { %v562_v10 = vpop.permute.xlu1 %561 }
 0xf3e   :  { %v564_v11 = vadd.f32 %v562_v10, %v554_v9 }
 0xf40   :  { %1011 = vtanh.f32 %v564_v11 }
 0xf4d   :  { %v1012_v12 = vpop.eup %1011 }
 0xf4e   :  { %567 = vrot.lane.b32.xlu0 %v1012_v12, %s1033_s1 }
 0xfc0   :  { %v568_v13 = vpop.permute.xlu0 %567 }
 0xfc1   :  { %v570_v16 = vmul.f32 %v1010_v7, %v568_v13 }
 0xfc3   :  { %v571_v20 = vpack.c.bf16 %v570_v16, %v570_v16 }
 0xfc5   :  { %573 = vrot.lane.b32.xlu1 %v571_v20, %s1036_s2 }
0x1037   :  { %v574_v21 = vpop.permute.xlu1 %573 }
0x1038   :  { %937 = vmatmul.mubr.msk.bf16.vlgmr.msra.gmra.mxu1 %vm214_vm2, %v574_v21 }
0x1039   :  { %956 = vmatprep.mubr.msk.f32.mxu1 %vm1035_vm1, %v1034_v17  ;;  %949 = vmatpush3.msra.mxu1 %v718_v56 }
0x103a   :  { %950 = vmatprep.subr.mxu1 %v1034_v17 }
0x103b   :  { %951 = vmatpush3.msra.mxu1 %v717_v57 }
0x103c   :  { %952 = vmatprep.subr.mxu1 %v1034_v17 }
0x103d   :  { %953 = vmatpush3.msra.mxu1 %v716_v58 }
0x103e   :  { %954 = vmatprep.subr.mxu1 %v1034_v17 }
0x103f   :  { %955 = vmatpush3.msra.mxu1 %v715_v59 }
0x10f8   :  { %v612_v23 = vpop.f32.mrf.mxu1 }
0x10f9   :  { %v618_v24 = vadd.f32 %v612_v23, %v162_v22 }
0x10fa   :  { %v938_v25 = vpop.f32.mrf.mxu1 }
0x10fb   :  { %1013 = vtanh.f32 %v618_v24  ;;  %v838_v29 = vmul.f32 -1.442695, %v618_v24 }
0x10fc   :  { %v615_v26 = vpop.f32.mrf.mxu1 }
0x10fd   :  { %1015 = vpow2.f32 %v838_v29 }
0x10fe   :  { %v939_v27 = vpop.f32.mrf.mxu1 }
0x1108   :  { %v1014_v28 = vpop.eup %1013 }
0x1109   :  { %628 = vrot.lane.b32.xlu0 %v1014_v28, %s1033_s1 }
0x110a   :  { %v1016_v30 = vpop.eup %1015 }
0x110b   :  { %v622_v31 = vadd.f32 1.0, %v1016_v30 }
0x110d   :  { %1017 = vrcp.f32 %v622_v31 }
0x111a   :  { %v1018_v32 = vpop.eup %1017 }
0x111b   :  { %v626_v15 = vmul.f32 %v1018_v32, %v564_v11 }
0x117b   :  { %v629_v33 = vpop.permute.xlu0 %628 }
0x117c   :  { %v631_v34 = vmul.f32 %v1018_v32, %v629_v33 }
0x117e   :  { %633 = vrot.lane.b32.xlu1 %v631_v34, %s1033_s1 }
0x11f0   :  { %v634_v35 = vpop.permute.xlu1 %633 }
0x11f1   :  { %v636_v36 = vadd.f32 %v634_v35, %v626_v15 }
0x11f3   :  { %1019 = vtanh.f32 %v636_v36 }
0x1200   :  { %v1020_v37 = vpop.eup %1019 }
0x1201   :  { %639 = vrot.lane.b32.xlu0 %v1020_v37, %s1033_s1 }
0x1273   :  { %v640_v38 = vpop.permute.xlu0 %639 }
0x1274   :  { %v642_v39 = vmul.f32 %v1018_v32, %v640_v38 }
0x1276   :  { %v643_v40 = vpack.c.bf16 %v642_v39, %v642_v39 }
0x1278   :  { %645 = vrot.lane.b32.xlu1 %v643_v40, %s1036_s2 }
0x12ea   :  { %v646_v41 = vpop.permute.xlu1 %645 }
0x12eb   :  { %945 = vmatmul.mubr.msk.bf16.vlgmr.msra.gmra.mxu0 %vm214_vm2, %v646_v41 }
0x13ab   :  { %v684_v43 = vpop.f32.mrf.mxu0 }
0x13ac   :  { %v690_v44 = vadd.f32 %v684_v43, %v167_v42 }
0x13ad   :  { %v946_v45 = vpop.f32.mrf.mxu0 }
0x13ae   :  { %1021 = vtanh.f32 %v690_v44  ;;  %v840_v49 = vmul.f32 -1.442695, %v690_v44 }
0x13af   :  { %v687_v46 = vpop.f32.mrf.mxu0 }
0x13b0   :  { %1023 = vpow2.f32 %v840_v49 }
0x13b1   :  { %v947_v47 = vpop.f32.mrf.mxu0 }
0x13bb   :  { %v1022_v48 = vpop.eup %1021 }
0x13bc   :  { %700 = vrot.lane.b32.xlu0 %v1022_v48, %s1033_s1 }
0x13bd   :  { %v1024_v50 = vpop.eup %1023 }
0x13be   :  { %v694_v51 = vadd.f32 1.0, %v1024_v50 }
0x13c0   :  { %1025 = vrcp.f32 %v694_v51 }
0x13cd   :  { %v1026_v52 = vpop.eup %1025 }
0x13ce   :  { %v698_v4 = vmul.f32 %v1026_v52, %v636_v36 }
0x142e   :  { %v701_v53 = vpop.permute.xlu0 %700 }
0x142f   :  { %v703_v54 = vmul.f32 %v1026_v52, %v701_v53 }
0x1431   :  { %705 = vrot.lane.b32.xlu1 %v703_v54, %s1033_s1 }
0x14a3   :  { %v706_v14 = vpop.permute.xlu1 %705 }
0x14a4   :  { %v708_v55 = vadd.f32 %v706_v14, %v698_v4 }
0x14a6   :  { %1027 = vtanh.f32 %v708_v55 }
0x14b3   :  { %v1028_v60 = vpop.eup %1027 }
0x14b4   :  { %711 = vrot.lane.b32.xlu0 %v1028_v60, %s1033_s1 }
0x1526   :  { %v712_v61 = vpop.permute.xlu0 %711 }
0x1527   :  { %v714_v62 = vmul.f32 %v1026_v52, %v712_v61 }
0x1529   :  { %727 = vrot.lane.b32.xlu1 %v714_v62, %s1036_s2 }
0x159b   :  { %v728_v63 = vpop.permute.xlu1 %727 }
0x159c   :  { %957 = vmatmul.mubr.msk.f32.vlgmr.msra.gmra.mxu1 %vm214_vm2, %v728_v63 }
0x165c   :  { %v797_v1 = vpop.f32.mrf.mxu1 }
0x165d   :  { %v798_v2 = vadd.f32 %v841_v0, %v797_v1 }
0x165e   :  { %v958_v3 = vpop.f32.mrf.mxu1 }
0x165f   :  { %801 = vmax.xlane.f32.xlu0 %v798_v2 }
0x16e8   :  { %v802_v17 = vpop.xlane.xlu0 %801 }
0x16e9   :  { %v803_v18 = vsub.f32 %v798_v2, %v802_v17 }
0x16eb   :  { %v804_v5 = vmul.f32 1.442695, %v803_v18 }
0x16ed   :  { %1029 = vpow2.f32 %v804_v5 }
0x16fa   :  { %v1030_v6 = vpop.eup %1029 }
0x16fb   :  { %806 = vadd.xlane.f32.xlu1 %v1030_v6 }
0x1784   :  { %v807_v7 = vpop.xlane.xlu1 %806 }
0x1785   :  { %1031 = vrcp.f32 %v807_v7 }
0x1792   :  { %v1032_v8 = vpop.eup %1031 }
0x1793   :  { %v809_v19 = vmul.f32 %v1032_v8, %v1030_v6 }
0x1795   :  { %810 = vst [vmem:[%s1251_s6] sm:$0xff] %v809_v19 }

</bundles_post_ra>
